<compile_context>
chip_gen: v5e
topology: v5e:2x2
jax: 0.10.0
libtpu: 0.0.40
codegen_flags: <defaults>
</compile_context>

<pallas_src>
import math

import jax
import jax.numpy as jnp
import numpy as np
from jax.experimental import pallas as pl
from jax.experimental.pallas import tpu as pltpu

# log(1e-45): what PyTorch's (mask + 1e-45).log() yields at masked positions.
_LOG_TINY = math.log(1e-45)
# Smallest f32 normal-ish floor so jnp.log never sees a flushed denormal.
_NORMAL_FLOOR = 1e-37
# Pad value for padded vocab lanes: exp(shifted) underflows to exactly 0.
_PAD_NEG = -1e30


def _mask_log_softmax_kernel(logits_ref, mask_ref, out_ref):
    x = logits_ref[...].astype(jnp.float32)
    m = mask_ref[...].astype(jnp.float32)

    # logits + log(mask + 1e-45), robust to TPU flush-to-zero of denormals.
    log_mask = jnp.where(
        m > 0.0,
        jnp.log(jnp.maximum(m, jnp.float32(_NORMAL_FLOOR))),
        jnp.float32(_LOG_TINY),
    )
    x = x + log_mask

    # Numerically-stable log_softmax along the last (lane) dim.
    x_max = jnp.max(x, axis=-1, keepdims=True)
    shifted = x - x_max
    lse = jnp.log(jnp.sum(jnp.exp(shifted), axis=-1, keepdims=True))
    out_ref[...] = (shifted - lse).astype(out_ref.dtype)


def _sublane_multiple(dtype) -> int:
    itemsize = jnp.dtype(dtype).itemsize
    return max(8, 32 // max(itemsize, 1))  # 8 for 4B, 16 for 2B, 32 for 1B


def mask_log_softmax(logits, output_mask, *, block_rows=None,
                     vmem_limit_bytes=48 * 1024 * 1024):
    """Pallas implementation of Mask_Softmax.forward.

    logits, output_mask: same shape [..., V]. log_softmax over the last dim.
    """
    assert logits.shape == output_mask.shape
    orig_shape = logits.shape
    V = orig_shape[-1]
    rows = 1
    for d in orig_shape[:-1]:
        rows *= int(d)
    rows = max(rows, 1)

    out_dtype = logits.dtype
    logits2d = logits.reshape(rows, V)
    mask2d = output_mask.reshape(rows, V)

    # --- Pad V up to a multiple of 128 so stores are lane-dense. -------------
    Vp = ((V + 127) // 128) * 128
    if Vp != V:
        pad_v = Vp - V
        # Padded lanes: logit = -1e30, mask = 1 -> exp() contributes exactly 0.
        logits2d = jnp.pad(logits2d, ((0, 0), (0, pad_v)),
                           constant_values=jnp.asarray(_PAD_NEG, out_dtype))
        mask2d = jnp.pad(mask2d, ((0, 0), (0, pad_v)),
                         constant_values=jnp.asarray(1, mask2d.dtype))

    # --- Choose a large, VMEM-friendly row block. ----------------------------
    sub = max(_sublane_multiple(logits2d.dtype),
              _sublane_multiple(mask2d.dtype),
              _sublane_multiple(out_dtype))
    bytes_per_row = Vp * (jnp.dtype(logits2d.dtype).itemsize
                          + jnp.dtype(mask2d.dtype).itemsize
                          + jnp.dtype(out_dtype).itemsize)
    # Keep the double-buffered 2-in/1-out working set around ~12 MiB so the
    # same tile fits v5e/v6e/v7x VMEM budgets with headroom.
    budget = 12 * 1024 * 1024
    cap = max(sub, (budget // (2 * bytes_per_row)) // sub * sub)
    if block_rows is None:
        br = min(1024, cap)
    else:
        br = max(sub, (block_rows // sub) * sub)
    # Don't make the block bigger than the (sublane-rounded) problem.
    rows_rounded = ((rows + sub - 1) // sub) * sub
    br = min(br, rows_rounded)
    br = max(br, sub)

    # --- Pad rows to a multiple of the block (mask=1 keeps pad rows benign). -
    grid_rows = pl.cdiv(rows, br)
    rows_p = grid_rows * br
    if rows_p != rows:
        pad_r = rows_p - rows
        logits2d = jnp.pad(logits2d, ((0, pad_r), (0, 0)))
        mask2d = jnp.pad(mask2d, ((0, pad_r), (0, 0)),
                         constant_values=jnp.asarray(1, mask2d.dtype))

    spec = pl.BlockSpec((br, Vp), lambda i: (i, 0))

    out2d = pl.pallas_call(
        _mask_log_softmax_kernel,
        out_shape=jax.ShapeDtypeStruct((rows_p, Vp), out_dtype),
        grid_spec=pltpu.PrefetchScalarGridSpec(
            num_scalar_prefetch=0,
            grid=(grid_rows,),
            in_specs=[spec, spec],
            out_specs=spec,
        ),
        compiler_params=pltpu.CompilerParams(
            dimension_semantics=("parallel",),
            vmem_limit_bytes=vmem_limit_bytes,
        ),
    )(logits2d, mask2d)

    out2d = out2d[:rows, :V]
    return out2d.reshape(orig_shape)


def _reference_np(logits, mask):
    """PyTorch-faithful reference in float64 on host (no denormal flushing)."""
    x = np.asarray(logits, dtype=np.float64) + np.log(
        np.asarray(mask, dtype=np.float64) + 1e-45)
    x_max = x.max(axis=-1, keepdims=True)
    shifted = x - x_max
    lse = np.log(np.exp(shifted).sum(axis=-1, keepdims=True))
    return shifted - lse


if __name__ == "__main__":
    key = jax.random.PRNGKey(0)

    # --- Case 1: shapes consistent with the module (batch=2, seq=8, V=128). --
    B, T, V = 2, 8, 128
    k1, k2, k3, k4 = jax.random.split(key, 4)
    logits = jax.random.normal(k1, (B, T, V), dtype=jnp.float32)
    mask = (jax.random.uniform(k2, (B, T, V)) > 0.5).astype(jnp.float32)
    mask = mask.at[..., 0].set(1.0)  # at least one valid position per row

    out = jax.block_until_ready(mask_log_softmax(logits, mask))
    ref = _reference_np(logits, mask)
    assert np.allclose(np.asarray(out, dtype=np.float64), ref,
                       atol=1e-3, rtol=1e-4), "mismatch vs reference (case 1)"

    # --- Case 2: ragged shapes (V not mult. of 128, odd rows) + edge cases. --
    B2, T2, V2 = 2, 7, 100
    logits2 = jax.random.normal(k3, (B2, T2, V2), dtype=jnp.float32)
    mask2 = (jax.random.uniform(k4, (B2, T2, V2)) > 0.5).astype(jnp.float32)
    mask2 = mask2.at[..., 0].set(1.0)
    mask2 = mask2.at[0, 0, :].set(0.0)  # a fully-masked row (stays finite)

    out2 = jax.block_until_ready(mask_log_softmax(logits2, mask2))
    ref2 = _reference_np(logits2, mask2)
    assert np.all(np.isfinite(np.asarray(out2))), "non-finite output (case 2)"
    assert np.allclose(np.asarray(out2, dtype=np.float64), ref2,
                       atol=1e-3, rtol=1e-4), "mismatch vs reference (case 2)"

    print("KERNEL_OK")
</pallas_src>

<mosaic_0001>
module attributes {stable_mosaic.version = 11 : i64} {
  func.func @_mask_log_softmax_kernel(%arg0: i32, %arg1: memref<16x128xf32, #tpu.memory_space<vmem>>, %arg2: memref<16x128xf32, #tpu.memory_space<vmem>>, %arg3: memref<16x128xf32, #tpu.memory_space<vmem>>) attributes {dimension_semantics = [#tpu.dimension_semantics<parallel>], iteration_bounds = array<i64: 1>, scalar_prefetch = 0 : i64, scratch_operands = 0 : i64, tpu.core_type = #tpu.core_type<tc>, window_params = [{transform_indices = @transform_0, window_bounds = array<i64: 16, 128>}, {transform_indices = @transform_1, window_bounds = array<i64: 16, 128>}, {transform_indices = @transform_2, window_bounds = array<i64: 16, 128>}]} {
    %c0 = arith.constant 0 : index
    %c0_0 = arith.constant 0 : index
    %0 = vector.load %arg1[%c0, %c0_0] : memref<16x128xf32, #tpu.memory_space<vmem>>, vector<16x128xf32>
    %c0_1 = arith.constant 0 : index
    %c0_2 = arith.constant 0 : index
    %1 = vector.load %arg2[%c0_1, %c0_2] : memref<16x128xf32, #tpu.memory_space<vmem>>, vector<16x128xf32>
    %cst = arith.constant 0.000000e+00 : f32
    %2 = vector.broadcast %cst : f32 to vector<16x128xf32>
    %3 = arith.cmpf ogt, %1, %2 : vector<16x128xf32>
    %cst_3 = arith.constant 9.99999991E-38 : f32
    %4 = vector.broadcast %cst_3 : f32 to vector<16x128xf32>
    %5 = arith.maximumf %1, %4 : vector<16x128xf32>
    %6 = math.log %5 : vector<16x128xf32>
    %cst_4 = arith.constant -103.616325 : f32
    %7 = vector.broadcast %cst_4 : f32 to vector<16x128xf32>
    %8 = arith.select %3, %6, %7 : vector<16x128xi1>, vector<16x128xf32>
    %9 = arith.addf %0, %8 : vector<16x128xf32>
    %cst_5 = arith.constant dense<0xFF800000> : vector<16xf32>
    %10 = vector.multi_reduction <maximumf>, %9, %cst_5 [1] : vector<16x128xf32> to vector<16xf32>
    %11 = vector.shape_cast %10 : vector<16xf32> to vector<16x1xf32>
    %12 = vector.broadcast %11 : vector<16x1xf32> to vector<16x128xf32>
    %13 = arith.subf %9, %12 : vector<16x128xf32>
    %14 = math.exp %13 : vector<16x128xf32>
    %cst_6 = arith.constant dense<0.000000e+00> : vector<16xf32>
    %15 = vector.multi_reduction <add>, %14, %cst_6 [1] : vector<16x128xf32> to vector<16xf32>
    %16 = vector.shape_cast %15 : vector<16xf32> to vector<16x1xf32>
    %17 = math.log %16 : vector<16x1xf32>
    %18 = vector.broadcast %17 : vector<16x1xf32> to vector<16x128xf32>
    %19 = arith.subf %13, %18 : vector<16x128xf32>
    %c0_7 = arith.constant 0 : index
    %c0_8 = arith.constant 0 : index
    %20 = vector.load %arg3[%c0_7, %c0_8] : memref<16x128xf32, #tpu.memory_space<vmem>>, vector<16x128xf32>
    tpu.vector_store %arg3[%c0_7, %c0_8], %19 {strides = array<i32>} : memref<16x128xf32, #tpu.memory_space<vmem>>, vector<16x128xf32>,
    return
  }
  func.func @transform_0(%arg0: i32) -> (i32, i32) {
    %c0_i32 = arith.constant 0 : i32
    %c0_i32_0 = arith.constant 0 : i32
    return %arg0, %c0_i32 : i32, i32
  }
  func.func @transform_1(%arg0: i32) -> (i32, i32) {
    %c0_i32 = arith.constant 0 : i32
    %c0_i32_0 = arith.constant 0 : i32
    return %arg0, %c0_i32 : i32, i32
  }
  func.func @transform_2(%arg0: i32) -> (i32, i32) {
    %c0_i32 = arith.constant 0 : i32
    %c0_i32_0 = arith.constant 0 : i32
    return %arg0, %c0_i32 : i32, i32
  }
}

</mosaic_0001>

<bundles_post_ra>
// kernel: tpu_custom_call.1
= control target key start
LH: loop header
LB: loop body
LE: loop exit
PB: predicated region body
PF: predicated region fallthrough
CT: control target
= control target key end

     0   :  { %7 = vsyncpa [#allocation3], 0  ;;  %s235_s0 = inlined_call_operand.hbm [shape: f32[16,128], index: 0, kind: input, shape index: {}]   ;;  %s236_s1 = inlined_call_operand.hbm [shape: f32[16,128], index: 1, kind: input, shape index: {}]   ;;  %s237_s2 = inlined_call_operand.hbm [shape: f32[16,128], index: 2, kind: output, shape index: {}]  }
   0x1   :  { %8 = vsyncpa [#allocation6], 0 }
   0x2   :  { %9 = vsyncpa [#allocation4], 0  ;;  %s14_s11 = sshll.u32 %s235_s0, 4  ;;  %s197_s12 = smov [#allocation2]   ;;  %s15_s11 = int_to_ptr.hbm [resolvable:$true] %s14_s11 }
   0x3   :  { %s16_s13 = sshll.u32 %s197_s12, 4  ;;  %s27_s16 = sshll.u32 %s236_s1, 4  ;;  %s17_s13 = int_to_ptr.vmem [resolvable:$true] %s16_s13  ;;  %s28_s16 = int_to_ptr.hbm [resolvable:$true] %s27_s16 }
   0x4   :  { %s198_s17 = smov 128   ;;  %s199_s18 = smov 8  }
   0x5   :  { %22 = dma.hbm_to_vmem [thread:$0]  %s15_s11, 256, %s17_s13, [#allocation3], %s198_s17, %s198_s17, %s199_s18  }
   0x6   :  { %s200_s19 = smov [#allocation5]  }
   0x7   :  { %s29_s20 = sshll.u32 %s200_s19, 4  ;;  %s30_s20 = int_to_ptr.vmem [resolvable:$true] %s29_s20 }
   0x8   :  { %35 = dma.hbm_to_vmem [thread:$0]  %s28_s16, 256, %s30_s20, [#allocation6], %s198_s17, %s198_s17, %s199_s18  }
   0x9   :  { %191 = dma.done.wait [#allocation3], 256  }
   0xa   :  { %192 = vsyncadd [#allocation3], 4294967040 }
   0xb   :  { %193 = dma.done.wait [#allocation6], 256  }
   0xc   :  { %194 = vsyncadd [#allocation6], 4294967040  ;;  %v46_v0 = vld [vmem:[#allocation5] sm:$0xff]  ;;  %v47_v2 = vld [vmem:[#allocation5 + $0x8] sm:$0xff]  ;;  %s201_s0 = smov [#allocation7]   ;;  %s88_s23 = sshll.u32 %s237_s2, 4  ;;  %s89_s23 = int_to_ptr.hbm [resolvable:$true] %s88_s23 }
   0xd   :  { %v50_v1 = vmax.f32 %v46_v0, 1e-37  ;;  %v51_v3 = vmax.f32 %v47_v2, 1e-37  ;;  %vm48_vm0 = vcmp.gt.f32.partialorder %v46_v0, 0.0  ;;  %v44_v6 = vld [vmem:[#allocation2] sm:$0xff] }
   0xe   :  { %vm49_vm1 = vcmp.gt.f32.partialorder %v47_v2, 0.0  ;;  %v45_v11 = vld [vmem:[#allocation2 + $0x8] sm:$0xff]  ;;  %s86_s1 = sshll.u32 %s201_s0, 4  ;;  %s87_s1 = int_to_ptr.vmem [resolvable:$true] %s86_s1 }
   0xf   :  { %107 = vlog2.f32 %v50_v1 }
  0x10   :  { %109 = vlog2.f32 %v51_v3 }
  0x15   :  { %v108_v4 = vpop.eup %107 }
  0x16   :  { %v110_v5 = vpop.eup %109  ;;  %v53_v7 = vmul.f32 0.6931472, %v108_v4 }
  0x17   :  { %v55_v9 = vmul.f32 0.6931472, %v110_v5 }
  0x18   :  { %v56_v8 = vsel %vm48_vm0, %v53_v7, -103.616325 }
  0x19   :  { %v58_v10 = vadd.f32 %v56_v8, %v44_v6  ;;  %v57_v12 = vsel %vm49_vm1, %v55_v9, -103.616325 }
  0x1a   :  { %v59_v13 = vadd.f32 %v57_v12, %v45_v11 }
  0x1b   :  { %60 = vmax.xlane.f32.xlu0 %v58_v10 }
  0x23   :  { %62 = vmax.xlane.f32.xlu0 %v59_v13 }
  0x8e   :  { %v61_v14 = vpop.xlane.xlu0 %60 }
  0x8f   :  { %v64_v15 = vsub.f32 %v58_v10, %v61_v14 }
  0x91   :  { %v66_v16 = vmul.f32 1.442695, %v64_v15 }
  0x93   :  { %111 = vpow2.f32 %v66_v16 }
  0x96   :  { %v63_v17 = vpop.xlane.xlu0 %62 }
  0x97   :  { %v65_v18 = vsub.f32 %v59_v13, %v63_v17 }
  0x99   :  { %v112_v19 = vpop.eup %111  ;;  %v68_v20 = vmul.f32 1.442695, %v65_v18 }
  0x9a   :  { %70 = vadd.xlane.f32.xlu1 %v112_v19 }
  0x9b   :  { %113 = vpow2.f32 %v68_v20 }
  0xa1   :  { %v114_v21 = vpop.eup %113 }
  0xa2   :  { %72 = vadd.xlane.f32.xlu1 %v114_v21 }
 0x10d   :  { %v71_v22 = vpop.xlane.xlu1 %70 }
 0x10e   :  { %115 = vlog2.f32 %v71_v22 }
 0x114   :  { %v116_v23 = vpop.eup %115 }
 0x115   :  { %v75_v24 = vmul.f32 0.6931472, %v116_v23  ;;  %v73_v25 = vpop.xlane.xlu1 %72 }
 0x116   :  { %117 = vlog2.f32 %v73_v25 }
 0x117   :  { %v78_v26 = vsub.f32 %v64_v15, %v75_v24 }
 0x119   :  { %80 = vst [vmem:[#allocation7] sm:$0xff] %v78_v26 }
 0x11c   :  { %v118_v27 = vpop.eup %117 }
 0x11d   :  { %v77_v28 = vmul.f32 0.6931472, %v118_v27 }
 0x11f   :  { %v79_v29 = vsub.f32 %v65_v18, %v77_v28 }
 0x121   :  { %81 = vst [vmem:[#allocation7 + $0x8] sm:$0xff] %v79_v29 }
 0x122   :  { %94 = dma.vmem_to_hbm [thread:$0]  %s87_s1, 256, %s89_s23, [#allocation4], %s198_s17, %s198_s17, %s199_s18  }
 0x123   :  { %195 = dma.done.wait [#allocation4], 256  }
 0x124   :  { %196 = vsyncadd [#allocation4], 4294967040 }
 0x125   :  { %99 = vsyncpa [#allocation3], 1 }
 0x126   :  { %100 = vsyncpa [#allocation6], 1 }
 0x127   :  { %101 = vsyncpa [#allocation4], 1 }

</bundles_post_ra>
